<compile_context>
chip_gen: v7x
topology: tpu7x:2x2x1
jax: 0.10.0
libtpu: 0.0.40
codegen_flags: <defaults>
</compile_context>

<pallas_src>
import functools

import jax
import jax.numpy as jnp
from jax import lax
from jax.experimental import pallas as pl
from jax.experimental.pallas import tpu as pltpu

EPS = 1e-5


def _encoder_kernel(x_ref, band1_ref, sh1_ref, band2_ref, sh2_ref, out_ref,
                    p1_ref, p2_ref, *, n, oh):
    """Whole-batch fused kernel: MaxPool + conv1 + BN1 + ReLU + conv2 + BN2 + ReLU.

    Layout: every row of every 2-D operand is one image row with (width, channels)
    flattened on the lane axis; all samples are stacked along the row axis.

    x_ref     : (4, N*OH, OW*Cin)     the 4 taps of each 2x2 pooling window
    band1_ref : (3, OW*Cin, OW*Cout)  conv1 banded weights per dy (dx shift + col pad + BN1 scale folded)
    sh1_ref   : (1, OW*Cout)          conv1 bias + BN1 shift, tiled over width
    band2_ref : (3, OW*Cout, OW*Cout) conv2 banded weights per dy (BN2 scale folded)
    sh2_ref   : (1, OW*Cout)
    out_ref   : (N*OH, OW*Cout)       lane-dense output rows
    p1_ref    : VMEM (N*(OH+2), OW*Cin)   row-padded conv1 input
    p2_ref    : VMEM (N*(OH+2), OW*Cout)  row-padded conv2 input
    """
    wc_in = p1_ref.shape[-1]
    wc_out = out_ref.shape[-1]
    hp = oh + 2                 # padded rows per sample
    nrows = n * hp - 2          # rows produced by each banded conv pass

    # ---- fused MaxPool2d(2,2): reduce the 4 window taps on the VPU ----
    pooled = jnp.maximum(jnp.maximum(x_ref[0], x_ref[1]),
                         jnp.maximum(x_ref[2], x_ref[3]))      # (N*OH, OW*Cin)

    # ---- row-padded conv1 input; only the 1-row zero borders are written ----
    for b in range(n):
        r0 = b * hp
        p1_ref[r0:r0 + 1, :] = jnp.zeros((1, wc_in), jnp.float32)
        p1_ref[r0 + hp - 1:r0 + hp, :] = jnp.zeros((1, wc_in), jnp.float32)
        p1_ref[r0 + 1:r0 + 1 + oh, :] = pooled[b * oh:(b + 1) * oh, :]

    # ---- conv1: 3 MXU matmuls (one per dy); dx shifts, zero column padding and
    #      the BN1 scale are folded into the banded weight matrices ----
    acc1 = jnp.zeros((nrows, wc_out), jnp.float32)
    for dy in range(3):
        acc1 += jnp.dot(p1_ref[dy:dy + nrows, :], band1_ref[dy],
                        preferred_element_type=jnp.float32)
    z = jnp.maximum(acc1 + sh1_ref[...], 0.0)                  # BN1 shift + ReLU

    # ---- row-padded conv2 input ----
    for b in range(n):
        r0 = b * hp
        p2_ref[r0:r0 + 1, :] = jnp.zeros((1, wc_out), jnp.float32)
        p2_ref[r0 + hp - 1:r0 + hp, :] = jnp.zeros((1, wc_out), jnp.float32)
        p2_ref[r0 + 1:r0 + 1 + oh, :] = z[r0:r0 + oh, :]

    # ---- conv2 ----
    acc2 = jnp.zeros((nrows, wc_out), jnp.float32)
    for dy in range(3):
        acc2 += jnp.dot(p2_ref[dy:dy + nrows, :], band2_ref[dy],
                        preferred_element_type=jnp.float32)
    o = jnp.maximum(acc2 + sh2_ref[...], 0.0)                  # BN2 shift + ReLU

    # ---- keep only each sample's interior rows (rows straddling samples are junk) ----
    for b in range(n):
        out_ref[b * oh:(b + 1) * oh, :] = o[b * hp:b * hp + oh, :]


def _band_weights(w_oihw, gamma, beta, bias, mean, var, n_pix):
    """Fold conv bias + inference BatchNorm into the conv, and build per-dy banded
    (n_pix*cin, n_pix*cout) matrices implementing the dx shifts and the zero column
    padding of a 3x3 'SAME' conv on (width*channels)-flattened rows."""
    cout, cin = w_oihw.shape[0], w_oihw.shape[1]
    scale = gamma / jnp.sqrt(var + EPS)                        # (cout,)
    shift = beta + (bias - mean) * scale                       # (cout,)
    w_hwio = jnp.transpose(w_oihw, (2, 3, 1, 0)).astype(jnp.float32)   # (3,3,cin,cout)
    w_scaled = w_hwio * scale.reshape(1, 1, 1, cout)           # BN scale folded into weights
    band = jnp.zeros((3, n_pix * cin, n_pix * cout), jnp.float32)
    for dx in range(3):
        for xo in range(n_pix):
            xi = xo + dx - 1                                   # padding = 1
            if 0 <= xi < n_pix:
                band = band.at[:, xi * cin:(xi + 1) * cin,
                               xo * cout:(xo + 1) * cout].set(w_scaled[:, dx])
    shift_tiled = jnp.tile(shift.astype(jnp.float32), n_pix).reshape(1, n_pix * cout)
    return band, shift_tiled


def encoder_forward(x_nchw, params):
    """Encoder forward. x_nchw: (N, Cin, H, W) f32 -> (N, Cout, H/2, W/2) f32."""
    (w1, b1, g1, bt1, rm1, rv1, w2, b2, g2, bt2, rm2, rv2) = params
    n, cin, h, w = x_nchw.shape
    cout = w1.shape[0]
    oh, ow = h // 2, w // 2            # pooled sizes (fresh names: no shadowing of w2)

    # Single layout rearrangement (fused by XLA): NCHW -> NHWC, then expose the 2x2
    # pooling window as the leading axis so the kernel does the max + all padding.
    x_nhwc = jnp.transpose(x_nchw, (0, 2, 3, 1))
    x_kernel = (x_nhwc.reshape(n, oh, 2, ow, 2, cin)
                .transpose(2, 4, 0, 1, 3, 5)                   # (2, 2, N, OH, OW, Cin)
                .reshape(4, n * oh, ow * cin))

    band1, sh1 = _band_weights(w1, g1, bt1, b1, rm1, rv1, ow)
    band2, sh2 = _band_weights(w2, g2, bt2, b2, rm2, rv2, ow)

    kernel = functools.partial(_encoder_kernel, n=n, oh=oh)
    out2d = pl.pallas_call(
        kernel,
        out_shape=jax.ShapeDtypeStruct((n * oh, ow * cout), jnp.float32),
        grid_spec=pltpu.PrefetchScalarGridSpec(
            num_scalar_prefetch=0,
            grid=(1,),                                         # whole problem in one step
            in_specs=[
                pl.BlockSpec((4, n * oh, ow * cin), lambda i: (0, 0, 0)),
                pl.BlockSpec((3, ow * cin, ow * cout), lambda i: (0, 0, 0)),
                pl.BlockSpec((1, ow * cout), lambda i: (0, 0)),
                pl.BlockSpec((3, ow * cout, ow * cout), lambda i: (0, 0, 0)),
                pl.BlockSpec((1, ow * cout), lambda i: (0, 0)),
            ],
            out_specs=pl.BlockSpec((n * oh, ow * cout), lambda i: (0, 0)),
            scratch_shapes=[
                pltpu.VMEM((n * (oh + 2), ow * cin), jnp.float32),
                pltpu.VMEM((n * (oh + 2), ow * cout), jnp.float32),
            ],
        ),
        compiler_params=pltpu.CompilerParams(
            dimension_semantics=("arbitrary",),
        ),
    )(x_kernel, band1, sh1, band2, sh2)

    # (N*OH, OW*Cout) -> NCHW to match the PyTorch module's output layout.
    return jnp.transpose(out2d.reshape(n, oh, ow, cout), (0, 3, 1, 2))


def encoder_reference(x_nchw, params):
    """Pure-JAX reference (same semantics) for validation."""
    (w1, b1, g1, bt1, rm1, rv1, w2, b2, g2, bt2, rm2, rv2) = params
    n, c, h, w = x_nchw.shape
    xp = x_nchw.reshape(n, c, h // 2, 2, w // 2, 2).max(axis=(3, 5))

    def conv(x, wgt, b):
        y = lax.conv_general_dilated(x, wgt, (1, 1), 'SAME',
                                     dimension_numbers=('NCHW', 'OIHW', 'NCHW'))
        return y + b.reshape(1, -1, 1, 1)

    def bn(x, g, bt, m, v):
        return (g.reshape(1, -1, 1, 1) * (x - m.reshape(1, -1, 1, 1))
                / jnp.sqrt(v.reshape(1, -1, 1, 1) + EPS) + bt.reshape(1, -1, 1, 1))

    y = jnp.maximum(bn(conv(xp, w1, b1), g1, bt1, rm1, rv1), 0.0)
    y = jnp.maximum(bn(conv(y, w2, b2), g2, bt2, rm2, rv2), 0.0)
    return y


def make_params(key, in_ch, out_ch):
    ks = jax.random.split(key, 8)
    w1 = 0.1 * jax.random.normal(ks[0], (out_ch, in_ch, 3, 3), jnp.float32)
    b1 = 0.05 * jax.random.normal(ks[1], (out_ch,), jnp.float32)
    g1 = 1.0 + 0.1 * jax.random.normal(ks[2], (out_ch,), jnp.float32)
    bt1 = 0.05 * jax.random.normal(ks[3], (out_ch,), jnp.float32)
    rm1 = 0.02 * jax.random.normal(ks[4], (out_ch,), jnp.float32)
    rv1 = 1.0 + 0.1 * jnp.abs(jax.random.normal(ks[5], (out_ch,), jnp.float32))
    w2 = 0.1 * jax.random.normal(ks[6], (out_ch, out_ch, 3, 3), jnp.float32)
    b2 = 0.05 * jax.random.normal(ks[7], (out_ch,), jnp.float32)
    g2 = g1 * 0.9 + 0.1
    bt2 = -bt1
    rm2 = rm1 * 0.5
    rv2 = rv1 * 1.1
    return (w1, b1, g1, bt1, rm1, rv1, w2, b2, g2, bt2, rm2, rv2)


if __name__ == "__main__":
    # TODO(synk): Dropout layers are flag-disabled here; BatchNorm uses inference-mode
    # (running-stat) semantics rather than training-mode batch statistics.
    key = jax.random.PRNGKey(0)
    k_x, k_p = jax.random.split(key)

    N, IN_CH, OUT_CH, H, W = 2, 4, 8, 16, 16
    x = jax.random.normal(k_x, (N, IN_CH, H, W), jnp.float32)
    params = make_params(k_p, IN_CH, OUT_CH)

    out = jax.block_until_ready(encoder_forward(x, params))
    ref = jax.block_until_ready(encoder_reference(x, params))

    assert out.shape == (N, OUT_CH, H // 2, W // 2), out.shape
    max_err = float(jnp.max(jnp.abs(out - ref)))
    assert jnp.allclose(out, ref, atol=1e-4, rtol=1e-4), max_err

    print("KERNEL_OK")
</pallas_src>

<mosaic_0001>
module attributes {stable_mosaic.version = 11 : i64} {
  func.func @_encoder_kernel(%arg0: i32, %arg1: memref<4x16x32xf32, #tpu.memory_space<vmem>>, %arg2: memref<3x32x64xf32, #tpu.memory_space<vmem>>, %arg3: memref<1x64xf32, #tpu.memory_space<vmem>>, %arg4: memref<3x64x64xf32, #tpu.memory_space<vmem>>, %arg5: memref<1x64xf32, #tpu.memory_space<vmem>>, %arg6: memref<16x64xf32, #tpu.memory_space<vmem>>, %arg7: memref<20x32xf32, #tpu.memory_space<vmem>>, %arg8: memref<20x64xf32, #tpu.memory_space<vmem>>) attributes {dimension_semantics = [#tpu.dimension_semantics<arbitrary>], iteration_bounds = array<i64: 1>, scalar_prefetch = 0 : i64, scratch_operands = 2 : i64, tpu.core_type = #tpu.core_type<tc>, window_params = [{pipeline_mode = #tpu.pipeline_mode<synchronous>, transform_indices = @transform_0, window_bounds = array<i64: 4, 16, 32>}, {pipeline_mode = #tpu.pipeline_mode<synchronous>, transform_indices = @transform_1, window_bounds = array<i64: 3, 32, 64>}, {pipeline_mode = #tpu.pipeline_mode<synchronous>, transform_indices = @transform_2, window_bounds = array<i64: 1, 64>}, {pipeline_mode = #tpu.pipeline_mode<synchronous>, transform_indices = @transform_3, window_bounds = array<i64: 3, 64, 64>}, {pipeline_mode = #tpu.pipeline_mode<synchronous>, transform_indices = @transform_4, window_bounds = array<i64: 1, 64>}, {pipeline_mode = #tpu.pipeline_mode<synchronous>, transform_indices = @transform_5, window_bounds = array<i64: 16, 64>}]} {
    %c0 = arith.constant 0 : index
    %c0_0 = arith.constant 0 : index
    %c0_1 = arith.constant 0 : index
    %0 = vector.load %arg1[%c0, %c0_0, %c0_1] : memref<4x16x32xf32, #tpu.memory_space<vmem>>, vector<1x16x32xf32>
    %1 = vector.shape_cast %0 : vector<1x16x32xf32> to vector<16x32xf32>
    %c1 = arith.constant 1 : index
    %c0_2 = arith.constant 0 : index
    %c0_3 = arith.constant 0 : index
    %2 = vector.load %arg1[%c1, %c0_2, %c0_3] : memref<4x16x32xf32, #tpu.memory_space<vmem>>, vector<1x16x32xf32>
    %3 = vector.shape_cast %2 : vector<1x16x32xf32> to vector<16x32xf32>
    %4 = arith.maximumf %1, %3 : vector<16x32xf32>
    %c2 = arith.constant 2 : index
    %c0_4 = arith.constant 0 : index
    %c0_5 = arith.constant 0 : index
    %5 = vector.load %arg1[%c2, %c0_4, %c0_5] : memref<4x16x32xf32, #tpu.memory_space<vmem>>, vector<1x16x32xf32>
    %6 = vector.shape_cast %5 : vector<1x16x32xf32> to vector<16x32xf32>
    %c3 = arith.constant 3 : index
    %c0_6 = arith.constant 0 : index
    %c0_7 = arith.constant 0 : index
    %7 = vector.load %arg1[%c3, %c0_6, %c0_7] : memref<4x16x32xf32, #tpu.memory_space<vmem>>, vector<1x16x32xf32>
    %8 = vector.shape_cast %7 : vector<1x16x32xf32> to vector<16x32xf32>
    %9 = arith.maximumf %6, %8 : vector<16x32xf32>
    %10 = arith.maximumf %4, %9 : vector<16x32xf32>
    %cst = arith.constant 0.000000e+00 : f32
    %11 = vector.broadcast %cst : f32 to vector<1x32xf32>
    %c0_8 = arith.constant 0 : index
    %c0_9 = arith.constant 0 : index
    %12 = vector.load %arg7[%c0_8, %c0_9] : memref<20x32xf32, #tpu.memory_space<vmem>>, vector<1x32xf32>
    tpu.vector_store %arg7[%c0_8, %c0_9], %11 {strides = array<i32>} : memref<20x32xf32, #tpu.memory_space<vmem>>, vector<1x32xf32>,
    %cst_10 = arith.constant 0.000000e+00 : f32
    %13 = vector.broadcast %cst_10 : f32 to vector<1x32xf32>
    %c9 = arith.constant 9 : index
    %c0_11 = arith.constant 0 : index
    %14 = vector.load %arg7[%c9, %c0_11] : memref<20x32xf32, #tpu.memory_space<vmem>>, vector<1x32xf32>
    tpu.vector_store %arg7[%c9, %c0_11], %13 {strides = array<i32>} : memref<20x32xf32, #tpu.memory_space<vmem>>, vector<1x32xf32>,
    %15 = vector.extract_strided_slice %10 {offsets = [0, 0], sizes = [8, 32], strides = [1, 1]} : vector<16x32xf32> to vector<8x32xf32>
    %c1_12 = arith.constant 1 : index
    %c0_13 = arith.constant 0 : index
    %16 = vector.load %arg7[%c1_12, %c0_13] : memref<20x32xf32, #tpu.memory_space<vmem>>, vector<8x32xf32>
    tpu.vector_store %arg7[%c1_12, %c0_13], %15 {strides = array<i32>} : memref<20x32xf32, #tpu.memory_space<vmem>>, vector<8x32xf32>,
    %cst_14 = arith.constant 0.000000e+00 : f32
    %17 = vector.broadcast %cst_14 : f32 to vector<1x32xf32>
    %c10 = arith.constant 10 : index
    %c0_15 = arith.constant 0 : index
    %18 = vector.load %arg7[%c10, %c0_15] : memref<20x32xf32, #tpu.memory_space<vmem>>, vector<1x32xf32>
    tpu.vector_store %arg7[%c10, %c0_15], %17 {strides = array<i32>} : memref<20x32xf32, #tpu.memory_space<vmem>>, vector<1x32xf32>,
    %cst_16 = arith.constant 0.000000e+00 : f32
    %19 = vector.broadcast %cst_16 : f32 to vector<1x32xf32>
    %c19 = arith.constant 19 : index
    %c0_17 = arith.constant 0 : index
    %20 = vector.load %arg7[%c19, %c0_17] : memref<20x32xf32, #tpu.memory_space<vmem>>, vector<1x32xf32>
    tpu.vector_store %arg7[%c19, %c0_17], %19 {strides = array<i32>} : memref<20x32xf32, #tpu.memory_space<vmem>>, vector<1x32xf32>,
    %21 = vector.extract_strided_slice %10 {offsets = [8, 0], sizes = [8, 32], strides = [1, 1]} : vector<16x32xf32> to vector<8x32xf32>
    %c11 = arith.constant 11 : index
    %c0_18 = arith.constant 0 : index
    %22 = vector.load %arg7[%c11, %c0_18] : memref<20x32xf32, #tpu.memory_space<vmem>>, vector<8x32xf32>
    tpu.vector_store %arg7[%c11, %c0_18], %21 {strides = array<i32>} : memref<20x32xf32, #tpu.memory_space<vmem>>, vector<8x32xf32>,
    %cst_19 = arith.constant 0.000000e+00 : f32
    %23 = vector.broadcast %cst_19 : f32 to vector<18x64xf32>
    %c0_20 = arith.constant 0 : index
    %c0_21 = arith.constant 0 : index
    %24 = vector.load %arg7[%c0_20, %c0_21] : memref<20x32xf32, #tpu.memory_space<vmem>>, vector<18x32xf32>
    %c0_22 = arith.constant 0 : index
    %c0_23 = arith.constant 0 : index
    %c0_24 = arith.constant 0 : index
    %25 = vector.load %arg2[%c0_22, %c0_23, %c0_24] : memref<3x32x64xf32, #tpu.memory_space<vmem>>, vector<1x32x64xf32>
    %26 = vector.shape_cast %25 : vector<1x32x64xf32> to vector<32x64xf32>
    %cst_25 = arith.constant dense<0.000000e+00> : vector<18x64xf32>
    %27 = tpu.matmul %24, %26, %cst_25 {dimension_numbers = #tpu.dot_dimension_numbers<[1], [0], [0], [1], [0, 0, 1, 1], [], []>} : vector<18x32xf32>, vector<32x64xf32>, vector<18x64xf32> -> vector<18x64xf32>
    %28 = arith.addf %23, %27 : vector<18x64xf32>
    %c1_26 = arith.constant 1 : index
    %c0_27 = arith.constant 0 : index
    %29 = vector.load %arg7[%c1_26, %c0_27] : memref<20x32xf32, #tpu.memory_space<vmem>>, vector<18x32xf32>
    %c1_28 = arith.constant 1 : index
    %c0_29 = arith.constant 0 : index
    %c0_30 = arith.constant 0 : index
    %30 = vector.load %arg2[%c1_28, %c0_29, %c0_30] : memref<3x32x64xf32, #tpu.memory_space<vmem>>, vector<1x32x64xf32>
    %31 = vector.shape_cast %30 : vector<1x32x64xf32> to vector<32x64xf32>
    %cst_31 = arith.constant dense<0.000000e+00> : vector<18x64xf32>
    %32 = tpu.matmul %29, %31, %cst_31 {dimension_numbers = #tpu.dot_dimension_numbers<[1], [0], [0], [1], [0, 0, 1, 1], [], []>} : vector<18x32xf32>, vector<32x64xf32>, vector<18x64xf32> -> vector<18x64xf32>
    %33 = arith.addf %28, %32 : vector<18x64xf32>
    %c2_32 = arith.constant 2 : index
    %c0_33 = arith.constant 0 : index
    %34 = vector.load %arg7[%c2_32, %c0_33] : memref<20x32xf32, #tpu.memory_space<vmem>>, vector<18x32xf32>
    %c2_34 = arith.constant 2 : index
    %c0_35 = arith.constant 0 : index
    %c0_36 = arith.constant 0 : index
    %35 = vector.load %arg2[%c2_34, %c0_35, %c0_36] : memref<3x32x64xf32, #tpu.memory_space<vmem>>, vector<1x32x64xf32>
    %36 = vector.shape_cast %35 : vector<1x32x64xf32> to vector<32x64xf32>
    %cst_37 = arith.constant dense<0.000000e+00> : vector<18x64xf32>
    %37 = tpu.matmul %34, %36, %cst_37 {dimension_numbers = #tpu.dot_dimension_numbers<[1], [0], [0], [1], [0, 0, 1, 1], [], []>} : vector<18x32xf32>, vector<32x64xf32>, vector<18x64xf32> -> vector<18x64xf32>
    %38 = arith.addf %33, %37 : vector<18x64xf32>
    %c0_38 = arith.constant 0 : index
    %c0_39 = arith.constant 0 : index
    %39 = vector.load %arg3[%c0_38, %c0_39] : memref<1x64xf32, #tpu.memory_space<vmem>>, vector<1x64xf32>
    %40 = vector.broadcast %39 : vector<1x64xf32> to vector<18x64xf32>
    %41 = arith.addf %38, %40 : vector<18x64xf32>
    %cst_40 = arith.constant 0.000000e+00 : f32
    %42 = vector.broadcast %cst_40 : f32 to vector<18x64xf32>
    %43 = arith.maximumf %41, %42 : vector<18x64xf32>
    %cst_41 = arith.constant 0.000000e+00 : f32
    %44 = vector.broadcast %cst_41 : f32 to vector<1x64xf32>
    %c0_42 = arith.constant 0 : index
    %c0_43 = arith.constant 0 : index
    %45 = vector.load %arg8[%c0_42, %c0_43] : memref<20x64xf32, #tpu.memory_space<vmem>>, vector<1x64xf32>
    tpu.vector_store %arg8[%c0_42, %c0_43], %44 {strides = array<i32>} : memref<20x64xf32, #tpu.memory_space<vmem>>, vector<1x64xf32>,
    %cst_44 = arith.constant 0.000000e+00 : f32
    %46 = vector.broadcast %cst_44 : f32 to vector<1x64xf32>
    %c9_45 = arith.constant 9 : index
    %c0_46 = arith.constant 0 : index
    %47 = vector.load %arg8[%c9_45, %c0_46] : memref<20x64xf32, #tpu.memory_space<vmem>>, vector<1x64xf32>
    tpu.vector_store %arg8[%c9_45, %c0_46], %46 {strides = array<i32>} : memref<20x64xf32, #tpu.memory_space<vmem>>, vector<1x64xf32>,
    %48 = vector.extract_strided_slice %43 {offsets = [0, 0], sizes = [8, 64], strides = [1, 1]} : vector<18x64xf32> to vector<8x64xf32>
    %c1_47 = arith.constant 1 : index
    %c0_48 = arith.constant 0 : index
    %49 = vector.load %arg8[%c1_47, %c0_48] : memref<20x64xf32, #tpu.memory_space<vmem>>, vector<8x64xf32>
    tpu.vector_store %arg8[%c1_47, %c0_48], %48 {strides = array<i32>} : memref<20x64xf32, #tpu.memory_space<vmem>>, vector<8x64xf32>,
    %cst_49 = arith.constant 0.000000e+00 : f32
    %50 = vector.broadcast %cst_49 : f32 to vector<1x64xf32>
    %c10_50 = arith.constant 10 : index
    %c0_51 = arith.constant 0 : index
    %51 = vector.load %arg8[%c10_50, %c0_51] : memref<20x64xf32, #tpu.memory_space<vmem>>, vector<1x64xf32>
    tpu.vector_store %arg8[%c10_50, %c0_51], %50 {strides = array<i32>} : memref<20x64xf32, #tpu.memory_space<vmem>>, vector<1x64xf32>,
    %cst_52 = arith.constant 0.000000e+00 : f32
    %52 = vector.broadcast %cst_52 : f32 to vector<1x64xf32>
    %c19_53 = arith.constant 19 : index
    %c0_54 = arith.constant 0 : index
    %53 = vector.load %arg8[%c19_53, %c0_54] : memref<20x64xf32, #tpu.memory_space<vmem>>, vector<1x64xf32>
    tpu.vector_store %arg8[%c19_53, %c0_54], %52 {strides = array<i32>} : memref<20x64xf32, #tpu.memory_space<vmem>>, vector<1x64xf32>,
    %54 = vector.extract_strided_slice %43 {offsets = [10, 0], sizes = [8, 64], strides = [1, 1]} : vector<18x64xf32> to vector<8x64xf32>
    %c11_55 = arith.constant 11 : index
    %c0_56 = arith.constant 0 : index
    %55 = vector.load %arg8[%c11_55, %c0_56] : memref<20x64xf32, #tpu.memory_space<vmem>>, vector<8x64xf32>
    tpu.vector_store %arg8[%c11_55, %c0_56], %54 {strides = array<i32>} : memref<20x64xf32, #tpu.memory_space<vmem>>, vector<8x64xf32>,
    %cst_57 = arith.constant 0.000000e+00 : f32
    %56 = vector.broadcast %cst_57 : f32 to vector<18x64xf32>
    %c0_58 = arith.constant 0 : index
    %c0_59 = arith.constant 0 : index
    %57 = vector.load %arg8[%c0_58, %c0_59] : memref<20x64xf32, #tpu.memory_space<vmem>>, vector<18x64xf32>
    %c0_60 = arith.constant 0 : index
    %c0_61 = arith.constant 0 : index
    %c0_62 = arith.constant 0 : index
    %58 = vector.load %arg4[%c0_60, %c0_61, %c0_62] : memref<3x64x64xf32, #tpu.memory_space<vmem>>, vector<1x64x64xf32>
    %59 = vector.shape_cast %58 : vector<1x64x64xf32> to vector<64x64xf32>
    %cst_63 = arith.constant dense<0.000000e+00> : vector<18x64xf32>
    %60 = tpu.matmul %57, %59, %cst_63 {dimension_numbers = #tpu.dot_dimension_numbers<[1], [0], [0], [1], [0, 0, 1, 1], [], []>} : vector<18x64xf32>, vector<64x64xf32>, vector<18x64xf32> -> vector<18x64xf32>
    %61 = arith.addf %56, %60 : vector<18x64xf32>
    %c1_64 = arith.constant 1 : index
    %c0_65 = arith.constant 0 : index
    %62 = vector.load %arg8[%c1_64, %c0_65] : memref<20x64xf32, #tpu.memory_space<vmem>>, vector<18x64xf32>
    %c1_66 = arith.constant 1 : index
    %c0_67 = arith.constant 0 : index
    %c0_68 = arith.constant 0 : index
    %63 = vector.load %arg4[%c1_66, %c0_67, %c0_68] : memref<3x64x64xf32, #tpu.memory_space<vmem>>, vector<1x64x64xf32>
    %64 = vector.shape_cast %63 : vector<1x64x64xf32> to vector<64x64xf32>
    %cst_69 = arith.constant dense<0.000000e+00> : vector<18x64xf32>
    %65 = tpu.matmul %62, %64, %cst_69 {dimension_numbers = #tpu.dot_dimension_numbers<[1], [0], [0], [1], [0, 0, 1, 1], [], []>} : vector<18x64xf32>, vector<64x64xf32>, vector<18x64xf32> -> vector<18x64xf32>
    %66 = arith.addf %61, %65 : vector<18x64xf32>
    %c2_70 = arith.constant 2 : index
    %c0_71 = arith.constant 0 : index
    %67 = vector.load %arg8[%c2_70, %c0_71] : memref<20x64xf32, #tpu.memory_space<vmem>>, vector<18x64xf32>
    %c2_72 = arith.constant 2 : index
    %c0_73 = arith.constant 0 : index
    %c0_74 = arith.constant 0 : index
    %68 = vector.load %arg4[%c2_72, %c0_73, %c0_74] : memref<3x64x64xf32, #tpu.memory_space<vmem>>, vector<1x64x64xf32>
    %69 = vector.shape_cast %68 : vector<1x64x64xf32> to vector<64x64xf32>
    %cst_75 = arith.constant dense<0.000000e+00> : vector<18x64xf32>
    %70 = tpu.matmul %67, %69, %cst_75 {dimension_numbers = #tpu.dot_dimension_numbers<[1], [0], [0], [1], [0, 0, 1, 1], [], []>} : vector<18x64xf32>, vector<64x64xf32>, vector<18x64xf32> -> vector<18x64xf32>
    %71 = arith.addf %66, %70 : vector<18x64xf32>
    %c0_76 = arith.constant 0 : index
    %c0_77 = arith.constant 0 : index
    %72 = vector.load %arg5[%c0_76, %c0_77] : memref<1x64xf32, #tpu.memory_space<vmem>>, vector<1x64xf32>
    %73 = vector.broadcast %72 : vector<1x64xf32> to vector<18x64xf32>
    %74 = arith.addf %71, %73 : vector<18x64xf32>
    %cst_78 = arith.constant 0.000000e+00 : f32
    %75 = vector.broadcast %cst_78 : f32 to vector<18x64xf32>
    %76 = arith.maximumf %74, %75 : vector<18x64xf32>
    %77 = vector.extract_strided_slice %76 {offsets = [0, 0], sizes = [8, 64], strides = [1, 1]} : vector<18x64xf32> to vector<8x64xf32>
    %c0_79 = arith.constant 0 : index
    %c0_80 = arith.constant 0 : index
    %78 = vector.load %arg6[%c0_79, %c0_80] : memref<16x64xf32, #tpu.memory_space<vmem>>, vector<8x64xf32>
    tpu.vector_store %arg6[%c0_79, %c0_80], %77 {strides = array<i32>} : memref<16x64xf32, #tpu.memory_space<vmem>>, vector<8x64xf32>,
    %79 = vector.extract_strided_slice %76 {offsets = [10, 0], sizes = [8, 64], strides = [1, 1]} : vector<18x64xf32> to vector<8x64xf32>
    %c8 = arith.constant 8 : index
    %c0_81 = arith.constant 0 : index
    %80 = vector.load %arg6[%c8, %c0_81] : memref<16x64xf32, #tpu.memory_space<vmem>>, vector<8x64xf32>
    tpu.vector_store %arg6[%c8, %c0_81], %79 {strides = array<i32>} : memref<16x64xf32, #tpu.memory_space<vmem>>, vector<8x64xf32>,
    return
  }
  func.func @transform_0(%arg0: i32) -> (i32, i32, i32) {
    %c0_i32 = arith.constant 0 : i32
    %c0_i32_0 = arith.constant 0 : i32
    %c0_i32_1 = arith.constant 0 : i32
    %c0_i32_2 = arith.constant 0 : i32
    return %c0_i32, %c0_i32_0, %c0_i32_1 : i32, i32, i32
  }
  func.func @transform_1(%arg0: i32) -> (i32, i32, i32) {
    %c0_i32 = arith.constant 0 : i32
    %c0_i32_0 = arith.constant 0 : i32
    %c0_i32_1 = arith.constant 0 : i32
    %c0_i32_2 = arith.constant 0 : i32
    return %c0_i32, %c0_i32_0, %c0_i32_1 : i32, i32, i32
  }
  func.func @transform_2(%arg0: i32) -> (i32, i32) {
    %c0_i32 = arith.constant 0 : i32
    %c0_i32_0 = arith.constant 0 : i32
    %c0_i32_1 = arith.constant 0 : i32
    return %c0_i32, %c0_i32_0 : i32, i32
  }
  func.func @transform_3(%arg0: i32) -> (i32, i32, i32) {
    %c0_i32 = arith.constant 0 : i32
    %c0_i32_0 = arith.constant 0 : i32
    %c0_i32_1 = arith.constant 0 : i32
    %c0_i32_2 = arith.constant 0 : i32
    return %c0_i32, %c0_i32_0, %c0_i32_1 : i32, i32, i32
  }
  func.func @transform_4(%arg0: i32) -> (i32, i32) {
    %c0_i32 = arith.constant 0 : i32
    %c0_i32_0 = arith.constant 0 : i32
    %c0_i32_1 = arith.constant 0 : i32
    return %c0_i32, %c0_i32_0 : i32, i32
  }
  func.func @transform_5(%arg0: i32) -> (i32, i32) {
    %c0_i32 = arith.constant 0 : i32
    %c0_i32_0 = arith.constant 0 : i32
    %c0_i32_1 = arith.constant 0 : i32
    return %c0_i32, %c0_i32_0 : i32, i32
  }
}

</mosaic_0001>

<bundles_post_ra>
// kernel: tpu_custom_call.1
= control target key start
LH: loop header
LB: loop body
LE: loop exit
PB: predicated region body
PF: predicated region fallthrough
CT: control target
= control target key end

     0   :  { %10 = vsyncpa [#allocation5], 0  ;;  %s1300_s0 = inlined_call_operand.hbm [shape: f32[4,16,32], index: 0, kind: input, shape index: {}]   ;;  %s1301_s1 = inlined_call_operand.hbm [shape: f32[3,32,64], index: 1, kind: input, shape index: {}]   ;;  %s1302_s2 = inlined_call_operand.vmem [shape: f32[1,64], index: 2, kind: input, shape index: {}]   ;;  %s1303_s3 = inlined_call_operand.hbm [shape: f32[3,64,64], index: 3, kind: input, shape index: {}]   ;;  %s1304_s4 = inlined_call_operand.vmem [shape: f32[1,64], index: 4, kind: input, shape index: {}]   ;;  %s1305_s5 = inlined_call_operand.hbm [shape: f32[16,64], index: 5, kind: output, shape index: {}]  }
   0x1   :  { %11 = vsyncpa [#allocation8], 0 }
   0x2   :  { %12 = vsyncpa [#allocation6], 0  ;;  %s1100_s18 = smov [#allocation7]   ;;  %s1101_s20 = smov [#allocation4]  }
   0x3   :  { %s30_s19 = sshll.u32 %s1100_s18, 4  ;;  %s18_s21 = sshll.u32 %s1101_s20, 4  ;;  %s31_s19 = int_to_ptr.vmem [resolvable:$true] %s30_s19  ;;  %s1139_s21 = int_to_ptr.vmem [resolvable:$true] %s18_s21 }
   0x4   :  { %s1006_s24 = scalar_lea.hbm %s1301_s1, 1536 }
   0x5   :  { %p1007_p0 = scmp.ne.s32.totalorder %s1301_s1, %s1006_s24  ;;  %p1010_p1 = scmp.lt.u32.totalorder %s1006_s24, %s1301_s1 }
   0x7   :  { %p1012_p2 = pnand %p1010_p1, %p1007_p0 }
   0x9   :  { %1015 = shalt.err (!%p1012_p2)
}
   0xa   :  { %s1016_s29 = scalar_lea.vmem %s31_s19, 1536  ;;  %p1021_p4 = scmp.lt.s32.totalorder %s31_s19, %s31_s19 }
   0xb   :  { %p1017_p3 = scmp.ne.s32.totalorder %s31_s19, %s1016_s29  ;;  %p1022_p5 = scmp.lt.s32.totalorder %s1016_s29, %s1016_s29 }
   0xd   :  { %p1023_p6 = por %p1022_p5, %p1021_p4 }
   0xf   :  { %p1024_p7 = pnand %p1023_p6, %p1017_p3 }
  0x11   :  { %1027 = shalt.err (!%p1024_p7)
}
  0x12   :  { %s1102_s30 = smov 128   ;;  %s1103_s6 = smov 8  }
  0x13   :  { %36 = dma.hbm_to_vmem [thread:$0]  %s1301_s1, 1536, %s31_s19, [#allocation8], %s1102_s30, %s1102_s30, %s1103_s6  }
  0x14   :  { %s1028_s11 = scalar_lea.hbm %s1300_s0, 1024 }
  0x15   :  { %p1029_p8 = scmp.ne.s32.totalorder %s1300_s0, %s1028_s11  ;;  %p1032_p9 = scmp.lt.u32.totalorder %s1028_s11, %s1300_s0 }
  0x17   :  { %p1034_p10 = pnand %p1032_p9, %p1029_p8 }
  0x19   :  { %1037 = shalt.err (!%p1034_p10)
}
  0x1a   :  { %s1038_s16 = scalar_lea.vmem %s1139_s21, 1024  ;;  %p1043_p12 = scmp.lt.s32.totalorder %s1139_s21, %s1139_s21 }
  0x1b   :  { %p1039_p11 = scmp.ne.s32.totalorder %s1139_s21, %s1038_s16  ;;  %p1044_p13 = scmp.lt.s32.totalorder %s1038_s16, %s1038_s16 }
  0x1d   :  { %p1045_p0 = por %p1044_p13, %p1043_p12 }
  0x1f   :  { %p1046_p1 = pnand %p1045_p0, %p1039_p11 }
  0x21   :  { %1049 = shalt.err (!%p1046_p1)
}
  0x22   :  { %24 = dma.hbm_to_vmem [thread:$0]  %s1300_s0, 1024, %s1139_s21, [#allocation5], %s1102_s30, %s1102_s30, %s1103_s6  }
  0x23   :  { %s1104_s18 = smov [#allocation9]   ;;  %s1050_s23 = scalar_lea.hbm %s1303_s3, 3072 }
  0x24   :  { %s44_s19 = sshll.u32 %s1104_s18, 4  ;;  %p1051_p2 = scmp.ne.s32.totalorder %s1303_s3, %s1050_s23  ;;  %s45_s19 = int_to_ptr.vmem [resolvable:$true] %s44_s19 }
  0x25   :  { %p1054_p3 = scmp.lt.u32.totalorder %s1050_s23, %s1303_s3 }
  0x27   :  { %p1056_p4 = pnand %p1054_p3, %p1051_p2 }
  0x29   :  { %1059 = shalt.err (!%p1056_p4)
}
  0x2a   :  { %s1060_s28 = scalar_lea.vmem %s45_s19, 3072  ;;  %p1065_p6 = scmp.lt.s32.totalorder %s45_s19, %s45_s19 }
  0x2b   :  { %p1061_p5 = scmp.ne.s32.totalorder %s45_s19, %s1060_s28  ;;  %p1066_p7 = scmp.lt.s32.totalorder %s1060_s28, %s1060_s28 }
  0x2d   :  { %p1067_p8 = por %p1066_p7, %p1065_p6 }
  0x2f   :  { %p1068_p9 = pnand %p1067_p8, %p1061_p5 }
  0x31   :  { %1071 = shalt.err (!%p1068_p9)
}
  0x32   :  { %50 = dma.hbm_to_vmem [thread:$0]  %s1303_s3, 3072, %s45_s19, [#allocation8], %s1102_s30, %s1102_s30, %s1103_s6  }
  0x33   :  { %1094 = dma.done.wait [#allocation5], 1024  }
  0x34   :  { %1095 = vsyncadd [#allocation5], 4294966272 }
  0x35   :  { %1096 = dma.done.wait [#allocation8], 4608  }
  0x36   :  { %1097 = vsyncadd [#allocation8], 4294962688  ;;  %v1105_v0 = vmov 0.0|0.0   ;;  %vm79_vm0 = vcmask 253952   ;;  %vm1106_vm1 = vmmov 0   ;;  %v1107_v1 = vmov 0.0  }
  0x37   :  { %943 = vmatprep.subr.bf16.mxu0 %v1105_v0  ;;  %949 = vmatprep.subr.bf16.mxu1 %v1105_v0  ;;  %80 = vst.msk [vmem:[#allocation2] sm:$0x1] %vm79_vm0, %v1107_v1  ;;  %81 = vst.msk [vmem:[#allocation2 + $0x9] sm:$0x1] %vm79_vm0, %v1107_v1  ;;  %v98_v2 = vld [vmem:[#allocation7 + $0x20] sm:$0xff]  ;;  %v99_v3 = vld [vmem:[#allocation7 + $0x28] sm:$0xff] }
  0x38   :  { %825 = vmatprep.mubr.msk.f32.mxu0 %vm1106_vm1, %v1107_v1  ;;  %842 = vmatprep.mubr.msk.f32.mxu1 %vm1106_vm1, %v1107_v1  ;;  %84 = vst.msk [vmem:[#allocation2 + $0xa] sm:$0x1] %vm79_vm0, %v1107_v1  ;;  %85 = vst.msk [vmem:[#allocation2 + $0x13] sm:$0x1] %vm79_vm0, %v1107_v1  ;;  %v90_v4 = vld [vmem:[#allocation7] sm:$0xff]  ;;  %v944_v5 = vpack.c.bf16 %v99_v3, %v98_v2  ;;  %v91_v6 = vld [vmem:[#allocation7 + $0x8] sm:$0xff] }
  0x39   :  { %v100_v7 = vld [vmem:[#allocation7 + $0x30] sm:$0xff]  ;;  %v101_v8 = vld [vmem:[#allocation7 + $0x38] sm:$0xff]  ;;  %v950_v9 = vpack.c.bf16 %v91_v6, %v90_v4  ;;  %v62_v12 = vld [vmem:[#allocation4] sm:$0xff]  ;;  %vm82_vm2 = vcmask 261120   ;;  %vm393_vm3 = vcmask 516096   ;;  %vm396_vm4 = vcmask 523264  }
  0x3a   :  { %v92_v10 = vld [vmem:[#allocation7 + $0x10] sm:$0xff]  ;;  %v93_v11 = vld [vmem:[#allocation7 + $0x18] sm:$0xff]  ;;  %945 = vmatpush3.bf16.msra.mxu0 %v944_v5  ;;  %v947_v13 = vpack.c.bf16 %v101_v8, %v100_v7  ;;  %v70_v15 = vld [vmem:[#allocation4 + $0x20] sm:$0xff]  ;;  %394 = vst.msk [vmem:[#allocation3] sm:$0x1] %vm393_vm3, %v1107_v1  ;;  %vm400_vm5 = vcmask 523266  }
  0x3b   :  { %v65_v14 = vld [vmem:[#allocation4 + $0x10] sm:$0xff]  ;;  %951 = vmatpush3.bf16.msra.mxu1 %v950_v9  ;;  %946 = vmatprep.subr.bf16.mxu0 %v1105_v0  ;;  %v953_v17 = vpack.c.bf16 %v93_v11, %v92_v10  ;;  %v63_v20 = vld [vmem:[#allocation4 + $0x8] sm:$0xff]  ;;  %v66_v21 = vld [vmem:[#allocation4 + $0x18] sm:$0xff]  ;;  %395 = vst.msk [vmem:[#allocation3 + $0x9] sm:$0x1] %vm393_vm3, %v1107_v1  ;;  %vm402_vm6 = vcmask 517120  }
  0x3c   :  { %v73_v16 = vld [vmem:[#allocation4 + $0x30] sm:$0xff]  ;;  %v67_v18 = vmax.f32 %v62_v12, %v65_v14  ;;  %952 = vmatprep.subr.bf16.mxu1 %v1105_v0  ;;  %v71_v22 = vld [vmem:[#allocation4 + $0x28] sm:$0xff]  ;;  %v74_v23 = vld [vmem:[#allocation4 + $0x38] sm:$0xff]  ;;  %v68_v25 = vmax.f32 %v63_v20, %v66_v21  ;;  %398 = vst.msk [vmem:[#allocation3 + $0xa] sm:$0x1] %vm393_vm3, %v1107_v1  ;;  %s1108_s8 = smov [#allocation10]  }
  0x3d   :  { %v75_v19 = vmax.f32 %v70_v15, %v73_v16  ;;  %v76_v26 = vmax.f32 %v71_v22, %v74_v23  ;;  %v284_v28 = vld [vmem:[#allocation7 + $0x40] sm:$0xff]  ;;  %v285_v29 = vld [vmem:[#allocation7 + $0x48] sm:$0xff]  ;;  %v286_v31 = vld [vmem:[#allocation7 + $0x50] sm:$0xff]  ;;  %399 = vst.msk [vmem:[#allocation3 + $0x13] sm:$0x1] %vm393_vm3, %v1107_v1  ;;  %s730_s9 = sshll.u32 %s1108_s8, 4  ;;  %s731_s9 = int_to_ptr.vmem [resolvable:$true] %s730_s9 }
  0x3e   :  { %948 = vmatpush3.bf16.msra.mxu0 %v947_v13  ;;  %v956_v30 = vpack.c.bf16 %v285_v29, %v284_v28  ;;  %v287_v32 = vld [vmem:[#allocation7 + $0x58] sm:$0xff]  ;;  %v419_v43 = vld [vmem:[#allocation9 + $0x40] sm:$0xff]  ;;  %v420_v44 = vld [vmem:[#allocation9 + $0x48] sm:$0xff]  ;;  %p1077_p11 = scmp.lt.s32.totalorder %s731_s9, %s731_s9 }
  0x3f   :  { %v77_v24 = vmax.f32 %v67_v18, %v75_v19  ;;  %954 = vmatpush3.bf16.msra.mxu1 %v953_v17  ;;  %955 = vmatprep.subr.bf16.mxu0 %v1105_v0  ;;  %v78_v27 = vmax.f32 %v68_v25, %v76_v26  ;;  %v959_v37 = vpack.c.bf16 %v287_v32, %v286_v31  ;;  %v407_v46 = vld [vmem:[#allocation9] sm:$0xff]  ;;  %v408_v47 = vld [vmem:[#allocation9 + $0x8] sm:$0xff]  ;;  %v421_v49 = vld [vmem:[#allocation9 + $0x50] sm:$0xff] }
  0x40   :  { %961 = vmatprep.subr.bf16.mxu1 %v1105_v0  ;;  %v962_v45 = vpack.c.bf16 %v420_v44, %v419_v43  ;;  %v974_v48 = vpack.c.bf16 %v408_v47, %v407_v46  ;;  %v422_v50 = vld [vmem:[#allocation9 + $0x58] sm:$0xff]  ;;  %v409_v52 = vld [vmem:[#allocation9 + $0x10] sm:$0xff]  ;;  %v423_v55 = vld [vmem:[#allocation9 + $0x60] sm:$0xff] }
  0x41   :  { %83 = vst.msk [vmem:[#allocation2 + $0x1] sm:$0xff] %vm82_vm2, %v77_v24  ;;  %86 = vst.msk [vmem:[#allocation2 + $0xb] sm:$0xff] %vm82_vm2, %v78_v27  ;;  %v965_v51 = vpack.c.bf16 %v422_v50, %v421_v49  ;;  %v410_v53 = vld [vmem:[#allocation9 + $0x18] sm:$0xff]  ;;  %v424_v56 = vld [vmem:[#allocation9 + $0x68] sm:$0xff] }
  0x42   :  { %v977_v54 = vpack.c.bf16 %v410_v53, %v409_v52  ;;  %v968_v57 = vpack.c.bf16 %v424_v56, %v423_v55  ;;  %v411_v58 = vld [vmem:[#allocation9 + $0x20] sm:$0xff]  ;;  %v412_v59 = vld [vmem:[#allocation9 + $0x28] sm:$0xff]  ;;  %v425_v61 = vld [vmem:[#allocation9 + $0x70] sm:$0xff] }
  0x43   :  { %v980_v60 = vpack.c.bf16 %v412_v59, %v411_v58  ;;  %v426_v62 = vld [vmem:[#allocation9 + $0x78] sm:$0xff]  ;;  %v413_v2 = vld [vmem:[#allocation9 + $0x30] sm:$0xff]  ;;  %v613_v44 = vld [vmem:[#allocation9 + $0xa0] sm:$0xff] }
  0x44   :  { %v971_v63 = vpack.c.bf16 %v426_v62, %v425_v61  ;;  %v414_v3 = vld [vmem:[#allocation9 + $0x38] sm:$0xff]  ;;  %v752_v21 = vld [vmem:[%s1302_s2] ss:$0 sm:$0xff] }
  0x45   :  { %v983_v4 = vpack.c.bf16 %v414_v3, %v413_v2  ;;  %v615_v49 = vld [vmem:[#allocation9 + $0xb0] sm:$0xff]  ;;  %v616_v50 = vld [vmem:[#allocation9 + $0xb8] sm:$0xff] }
  0x46   :  { %v995_v53 = vpack.c.bf16 %v616_v50, %v615_v49 }
  0x48   :  { %v94_v33 = vld [vmem:[#allocation2 + $0x1] sm:$0xff]  ;;  %v95_v35 = vld [vmem:[#allocation2 + $0x9] sm:$0xff]  ;;  %v96_v38 = vld [vmem:[#allocation2 + $0x11] sm:$0x3] }
  0x49   :  { %v87_v34 = vld [vmem:[#allocation2] sm:$0xff]  ;;  %826 = vmatmul.mubr.msk.f32.vlgmr.msra.gmra.mrb[0].mxu0 %vm82_vm2, %v94_v33  ;;  %v88_v36 = vld [vmem:[#allocation2 + $0x8] sm:$0xff]  ;;  %v89_v39 = vld [vmem:[#allocation2 + $0x10] sm:$0x3] }
  0x4a   :  { %843 = vmatmul.mubr.msk.f32.vlgmr.msra.gmra.mrb[0].mxu1 %vm82_vm2, %v87_v34  ;;  %957 = vmatpush3.bf16.msra.mxu0 %v956_v30  ;;  %v280_v40 = vld [vmem:[#allocation2 + $0x2] sm:$0xff]  ;;  %v281_v41 = vld [vmem:[#allocation2 + $0xa] sm:$0xff]  ;;  %v282_v42 = vld [vmem:[#allocation2 + $0x12] sm:$0x3] }
  0x4b   :  { %828 = vmatprep.mubr.msk.f32.mxu0 %vm1106_vm1, %v1107_v1  ;;  %845 = vmatprep.mubr.msk.f32.mxu1 %vm1106_vm1, %v1107_v1  ;;  %v609_v34 = vld [vmem:[#allocation9 + $0x80] sm:$0xff] }
  0x4c   :  { %958 = vmatprep.subr.bf16.mxu0 %v1105_v0  ;;  %963 = vmatpush3.bf16.msra.mxu1 %v962_v45  ;;  %v614_v45 = vld [vmem:[#allocation9 + $0xa8] sm:$0xff] }
  0x4d   :  { %829 = vmatmul.mubr.msk.f32.gmra.mrb[2].mxu0 %vm82_vm2, %v95_v35  ;;  %964 = vmatprep.subr.bf16.mxu1 %v1105_v0  ;;  %v610_v35 = vld [vmem:[#allocation9 + $0x88] sm:$0xff] }
  0x4e   :  { %846 = vmatmul.mubr.msk.f32.gmra.mrb[2].mxu1 %vm82_vm2, %v88_v36  ;;  %960 = vmatpush3.bf16.msra.mxu0 %v959_v37  ;;  %v986_v37 = vpack.c.bf16 %v610_v35, %v609_v34 }
  0x4f   :  { %831 = vmatprep.mubr.msk.f32.mxu0 %vm1106_vm1, %v1107_v1  ;;  %848 = vmatprep.mubr.msk.f32.mxu1 %vm1106_vm1, %v1107_v1 }
  0x50   :  { %973 = vmatprep.subr.bf16.mxu0 %v1105_v0  ;;  %966 = vmatpush3.bf16.msra.mxu1 %v965_v51 }
  0x51   :  { %832 = vmatmul.mubr.msk.f32.gmra.mrb[4].mxu0 %vm82_vm2, %v96_v38  ;;  %967 = vmatprep.subr.bf16.mxu1 %v1105_v0 }
  0x52   :  { %849 = vmatmul.mubr.msk.f32.gmra.mrb[4].mxu1 %vm82_vm2, %v89_v39  ;;  %859 = vmatprep.mubr.msk.f32.mxu0 %vm1106_vm1, %v1107_v1  ;;  %v611_v39 = vld [vmem:[#allocation9 + $0x90] sm:$0xff] }
  0x53   :  { %884 = vmatprep.mubr.msk.f32.mxu1 %vm1106_vm1, %v1107_v1 }
  0x54   :  { %969 = vmatpush3.bf16.msra.mxu1 %v968_v57 }
  0x55   :  { %860 = vmatmul.mubr.msk.f32.vlgmr.msra.gmra.mrb[6].mxu0 %vm82_vm2, %v280_v40  ;;  %970 = vmatprep.subr.bf16.mxu1 %v1105_v0  ;;  %v612_v40 = vld [vmem:[#allocation9 + $0x98] sm:$0xff] }
  0x56   :  { %862 = vmatprep.mubr.msk.f32.mxu0 %vm1106_vm1, %v1107_v1  ;;  %975 = vmatpush3.bf16.msra.mxu0 %v974_v48  ;;  %v989_v43 = vpack.c.bf16 %v612_v40, %v611_v39  ;;  %v992_v48 = vpack.c.bf16 %v614_v45, %v613_v44 }
  0x57   :  { %976 = vmatprep.subr.bf16.mxu0 %v1105_v0 }
  0x58   :  { %972 = vmatpush3.bf16.msra.mxu1 %v971_v63 }
  0x59   :  { %863 = vmatmul.mubr.msk.f32.gmra.mrb[8].mxu0 %vm82_vm2, %v281_v41  ;;  %985 = vmatprep.subr.bf16.mxu1 %v1105_v0 }
  0x5a   :  { %865 = vmatprep.mubr.msk.f32.mxu0 %vm1106_vm1, %v1107_v1  ;;  %978 = vmatpush3.bf16.msra.mxu0 %v977_v54 }
  0x5b   :  { %979 = vmatprep.subr.bf16.mxu0 %v1105_v0 }
  0x5d   :  { %866 = vmatmul.mubr.msk.f32.gmra.mrb[10].mxu0 %vm82_vm2, %v282_v42 }
  0x5e   :  { %909 = vmatprep.mubr.msk.f32.mxu0 %vm1106_vm1, %v1107_v1  ;;  %981 = vmatpush3.bf16.msra.mxu0 %v980_v60 }
  0x5f   :  { %982 = vmatprep.subr.bf16.mxu0 %v1105_v0 }
  0x62   :  { %984 = vmatpush3.bf16.msra.mxu0 %v983_v4 }
 0x11c   :  { %v177_v5 = vpop.f32.mrb[0].mxu0 }
 0x11d   :  { %v266_v6 = vpop.f32.mrb[0].mxu1  ;;  %v827_v8 = vpop.f32.mrb[1].mxu0 }
 0x11e   :  { %v267_v7 = vadd.f32 %v266_v6, %v177_v5  ;;  %v844_v9 = vpop.f32.mrb[1].mxu1 }
 0x120   :  { %v182_v10 = vpop.f32.mrb[2].mxu0 }
 0x121   :  { %v271_v11 = vpop.f32.mrb[2].mxu1  ;;  %v830_v13 = vpop.f32.mrb[3].mxu0 }
 0x122   :  { %v272_v12 = vadd.f32 %v271_v11, %v182_v10  ;;  %v847_v14 = vpop.f32.mrb[3].mxu1 }
 0x124   :  { %v187_v15 = vpop.f32.mrb[4].mxu0 }
 0x125   :  { %v276_v16 = vpop.f32.mrb[4].mxu1  ;;  %v833_v18 = vpop.f32.mrb[5].mxu0 }
 0x126   :  { %v277_v17 = vadd.f32 %v276_v16, %v187_v15  ;;  %v850_v19 = vpop.f32.mrb[5].mxu1 }
 0x128   :  { %v363_v20 = vpop.f32.mrb[6].mxu0 }
 0x129   :  { %v377_v22 = vadd.f32 %v363_v20, %v267_v7  ;;  %v861_v23 = vpop.f32.mrb[7].mxu0 }
 0x12b   :  { %v387_v24 = vadd.f32 %v752_v21, %v377_v22 }
 0x12c   :  { %v368_v25 = vpop.f32.mrb[8].mxu0 }
 0x12d   :  { %v390_v26 = vmax.f32 %v387_v24, 0.0  ;;  %v378_v27 = vadd.f32 %v368_v25, %v272_v12  ;;  %v864_v28 = vpop.f32.mrb[9].mxu0 }
 0x12f   :  { %397 = vst.msk [vmem:[#allocation3 + $0x1] sm:$0xff] %vm396_vm4, %v390_v26  ;;  %v388_v29 = vadd.f32 %v752_v21, %v378_v27 }
 0x130   :  { %v373_v30 = vpop.f32.mrb[10].mxu0 }
 0x131   :  { %v391_v31 = vmax.f32 %v388_v29, 0.0  ;;  %v379_v32 = vadd.f32 %v373_v30, %v277_v17  ;;  %v867_v33 = vpop.f32.mrb[11].mxu0 }
 0x133   :  { %401 = vst.msk [vmem:[#allocation3 + $0x9] sm:$0xfc] %vm400_vm5, %v391_v31  ;;  %v389_v36 = vadd.f32 %v752_v21, %v379_v32 }
 0x135   :  { %v392_v38 = vmax.f32 %v389_v36, 0.0 }
 0x136   :  { %v415_v41 = vld [vmem:[#allocation3 + $0x1] sm:$0xff] }
 0x137   :  { %v404_v42 = vld [vmem:[#allocation3] sm:$0xff]  ;;  %403 = vst.msk [vmem:[#allocation3 + $0x11] sm:$0x3] %vm402_vm6, %v392_v38  ;;  %885 = vmatmul.mubr.msk.f32.vlgmr.msra.gmra.mrb[6].mxu1 %vm396_vm4, %v415_v41 }
 0x138   :  { %910 = vmatmul.mubr.msk.f32.vlgmr.msra.gmra.mrb[12].mxu0 %vm396_vm4, %v404_v42  ;;  %987 = vmatpush3.bf16.msra.mxu1 %v986_v37  ;;  %v605_v54 = vld [vmem:[#allocation3 + $0x2] sm:$0xff] }
 0x139   :  { %887 = vmatprep.mubr.msk.f32.mxu1 %vm1106_vm1, %v1107_v1  ;;  %912 = vmatprep.mubr.msk.f32.mxu0 %vm1106_vm1, %v1107_v1 }
 0x13a   :  { %988 = vmatprep.subr.bf16.mxu1 %v1105_v0  ;;  %v416_v46 = vld [vmem:[#allocation3 + $0x9] sm:$0xff] }
 0x13b   :  { %v405_v47 = vld [vmem:[#allocation3 + $0x8] sm:$0xff]  ;;  %888 = vmatmul.mubr.msk.f32.gmra.mrb[8].mxu1 %vm396_vm4, %v416_v46 }
 0x13c   :  { %913 = vmatmul.mubr.msk.f32.gmra.mrb[14].mxu0 %vm396_vm4, %v405_v47  ;;  %990 = vmatpush3.bf16.msra.mxu1 %v989_v43 }
 0x13d   :  { %890 = vmatprep.mubr.msk.f32.mxu1 %vm1106_vm1, %v1107_v1  ;;  %915 = vmatprep.mubr.msk.f32.mxu0 %vm1106_vm1, %v1107_v1 }
 0x13e   :  { %991 = vmatprep.subr.bf16.mxu1 %v1105_v0  ;;  %v417_v51 = vld [vmem:[#allocation3 + $0x11] sm:$0x3] }
 0x13f   :  { %v406_v52 = vld [vmem:[#allocation3 + $0x10] sm:$0x3]  ;;  %891 = vmatmul.mubr.msk.f32.gmra.mrb[10].mxu1 %vm396_vm4, %v417_v51  ;;  %v607_v56 = vld [vmem:[#allocation3 + $0x12] sm:$0x3] }
 0x140   :  { %916 = vmatmul.mubr.msk.f32.gmra.mrb[16].mxu0 %vm396_vm4, %v406_v52  ;;  %993 = vmatpush3.bf16.msra.mxu1 %v992_v48  ;;  %v606_v55 = vld [vmem:[#allocation3 + $0xa] sm:$0xff] }
 0x141   :  { %934 = vmatprep.mubr.msk.f32.mxu1 %vm1106_vm1, %v1107_v1  ;;  %994 = vmatprep.subr.bf16.mxu1 %v1105_v0 }
 0x144   :  { %996 = vmatpush3.bf16.msra.mxu1 %v995_v53 }
 0x147   :  { %935 = vmatmul.mubr.msk.f32.vlgmr.msra.gmra.mrb[12].mxu1 %vm396_vm4, %v605_v54 }
 0x148   :  { %937 = vmatprep.mubr.msk.f32.mxu1 %vm1106_vm1, %v1107_v1 }
 0x14b   :  { %938 = vmatmul.mubr.msk.f32.gmra.mrb[14].mxu1 %vm396_vm4, %v606_v55 }
 0x14c   :  { %940 = vmatprep.mubr.msk.f32.mxu1 %vm1106_vm1, %v1107_v1  ;;  %v762_v1 = vld [vmem:[%s1304_s4] ss:$0 sm:$0xff]  ;;  %s1072_s4 = scalar_lea.vmem %s731_s9, 256 }
 0x14d   :  { %p1073_p10 = scmp.ne.s32.totalorder %s731_s9, %s1072_s4  ;;  %p1078_p12 = scmp.lt.s32.totalorder %s1072_s4, %s1072_s4 }
 0x14f   :  { %941 = vmatmul.mubr.msk.f32.gmra.mrb[16].mxu1 %vm396_vm4, %v607_v56  ;;  %p1079_p13 = por %p1078_p12, %p1077_p11 }
 0x151   :  { %p1080_p0 = pnand %p1079_p13, %p1073_p10 }
 0x20a   :  { %v502_v57 = vpop.f32.mrb[6].mxu1 }
 0x20b   :  { %v591_v58 = vpop.f32.mrb[12].mxu0  ;;  %v886_v0 = vpop.f32.mrb[7].mxu1 }
 0x20c   :  { %v592_v59 = vadd.f32 %v591_v58, %v502_v57  ;;  %v911_v60 = vpop.f32.mrb[13].mxu0 }
 0x20e   :  { %v507_v61 = vpop.f32.mrb[8].mxu1 }
 0x20f   :  { %v596_v62 = vpop.f32.mrb[14].mxu0  ;;  %v889_v2 = vpop.f32.mrb[9].mxu1 }
 0x210   :  { %v597_v63 = vadd.f32 %v596_v62, %v507_v61  ;;  %v914_v3 = vpop.f32.mrb[15].mxu0 }
 0x212   :  { %v512_v4 = vpop.f32.mrb[10].mxu1 }
 0x213   :  { %v601_v5 = vpop.f32.mrb[16].mxu0  ;;  %v892_v7 = vpop.f32.mrb[11].mxu1 }
 0x214   :  { %v602_v6 = vadd.f32 %v601_v5, %v512_v4  ;;  %v917_v8 = vpop.f32.mrb[17].mxu0 }
 0x21a   :  { %v692_v9 = vpop.f32.mrb[12].mxu1 }
 0x21b   :  { %v706_v10 = vadd.f32 %v692_v9, %v592_v59  ;;  %v936_v11 = vpop.f32.mrb[13].mxu1 }
 0x21d   :  { %v716_v12 = vadd.f32 %v762_v1, %v706_v10 }
 0x21e   :  { %v697_v13 = vpop.f32.mrb[14].mxu1 }
 0x21f   :  { %v719_v14 = vmax.f32 %v716_v12, 0.0  ;;  %v707_v15 = vadd.f32 %v697_v13, %v597_v63  ;;  %v939_v16 = vpop.f32.mrb[15].mxu1 }
 0x221   :  { %722 = vst.msk [vmem:[#allocation10] sm:$0xff] %vm396_vm4, %v719_v14  ;;  %v717_v17 = vadd.f32 %v762_v1, %v707_v15 }
 0x222   :  { %v702_v18 = vpop.f32.mrb[16].mxu1 }
 0x223   :  { %v720_v19 = vmax.f32 %v717_v17, 0.0  ;;  %v708_v20 = vadd.f32 %v702_v18, %v602_v6  ;;  %v942_v21 = vpop.f32.mrb[17].mxu1 }
 0x225   :  { %723 = vst.msk [vmem:[#allocation10 + $0x6] sm:$0xfc] %vm400_vm5, %v720_v19  ;;  %v718_v22 = vadd.f32 %v762_v1, %v708_v20 }
 0x227   :  { %v721_v23 = vmax.f32 %v718_v22, 0.0 }
 0x229   :  { %724 = vst.msk [vmem:[#allocation10 + $0xe] sm:$0x3] %vm402_vm6, %v721_v23 }
 0x22a   :  { %1083 = shalt.err (!%p1080_p0)
}
 0x22b   :  { %s1084_s12 = scalar_lea.hbm %s1305_s5, 256 }
 0x22c   :  { %p1085_p1 = scmp.ne.s32.totalorder %s1305_s5, %s1084_s12  ;;  %p1088_p2 = scmp.lt.u32.totalorder %s1084_s12, %s1305_s5 }
 0x22e   :  { %p1090_p3 = pnand %p1088_p2, %p1085_p1 }
 0x230   :  { %1093 = shalt.err (!%p1090_p3)
}
 0x231   :  { %736 = dma.vmem_to_hbm [thread:$0]  %s731_s9, 256, %s1305_s5, [#allocation6], %s1102_s30, %s1102_s30, %s1103_s6  }
 0x232   :  { %1098 = dma.done.wait [#allocation6], 256  }
 0x233   :  { %1099 = vsyncadd [#allocation6], 4294967040 }
 0x234   :  { %740 = vsyncpa [#allocation5], 1 }
 0x235   :  { %741 = vsyncpa [#allocation8], 1 }
 0x236   :  { %742 = vsyncpa [#allocation6], 1 }

</bundles_post_ra>
